<compile_context>
chip_gen: v5e
topology: v5e:2x2
jax: 0.10.0
libtpu: 0.0.40
codegen_flags: <defaults>
</compile_context>

<pallas_src>
import jax
import jax.numpy as jnp
from jax.experimental import pallas as pl
from jax.experimental.pallas import tpu as pltpu

GAMMA = 1.5
ALPHA = 0.25

_LANES = 128
_SUBLANES = 8
_TILE = _SUBLANES * _LANES              # one (8,128) tile = 1024 elements
_MAX_BLOCK_ROWS = 4096                  # (4096,128) f32 block = 2 MiB
_VMEM_LIMIT_BYTES = 32 * 1024 * 1024    # raise v5e's 16 MiB default; OK on v6e/v7x


def _multi_tensorcore():
    """True on parts where dimension_semantics='parallel' shards across >1 TC."""
    try:
        kind = jax.devices()[0].device_kind.lower()
    except Exception:
        return False
    return any(tag in kind for tag in ("v4", "v5p", "v7", "7x"))


def _make_kernel(rows_total, block_rows, inner_blocks, num_blocks,
                 gamma, alpha, fast_sigmoid):
    use_sqrt = (gamma == 1.5)
    nfold = block_rows // _SUBLANES
    a_bias = 1.0 - alpha            # alpha_factor = a_bias + y * a_scale
    a_scale = 2.0 * alpha - 1.0     # constants folded at trace time

    def kernel(pred_ref, true_ref, out_ref):
        core = pl.program_id(0)
        step = pl.program_id(1)

        @pl.when(step == 0)
        def _():
            out_ref[...] = jnp.zeros_like(out_ref)

        # Scalar-unit bookkeeping: un-clamped linear block id, rows remaining.
        lin_block = core * inner_blocks + step
        rows_left = rows_total - lin_block * block_rows

        # Skip clamped duplicate blocks entirely (uneven two-core split).
        @pl.when(lin_block < num_blocks)
        def _():
            x = pred_ref[...].astype(jnp.float32)
            y = true_ref[...].astype(jnp.float32)

            # Stable BCEWithLogits; s = exp(-|x|) is shared with the sigmoid.
            s = jnp.exp(-jnp.abs(x))
            bce = jnp.maximum(x, 0.0) - x * y + jnp.log1p(s)

            denom = 1.0 + s
            if fast_sigmoid:
                # EUP approximate reciprocal + one Newton-Raphson refinement:
                # cheaper than the VALU divide, accuracy ~f32.
                r = pl.reciprocal(denom, approx=True)
                inv = r * (2.0 - denom * r)
            else:
                inv = 1.0 / denom
            pred_prob = jnp.where(x >= 0.0, inv, s * inv)   # == sigmoid(x)

            alpha_factor = a_bias + y * a_scale
            t = jnp.abs(y - pred_prob)
            modulating = t * jnp.sqrt(t) if use_sqrt else t ** gamma
            loss = bce * alpha_factor * modulating

            # Fast path: full block, no per-element masking at all.
            @pl.when(rows_left >= block_rows)
            def _():
                out_ref[...] += loss.reshape(nfold, _SUBLANES, _LANES).sum(axis=0)

            # Slow path: the single ragged last block.  The bulk is 128-lane
            # aligned, so masking whole rows against the scalar remainder is
            # sufficient (and overflow-safe for huge tensors).
            @pl.when(rows_left < block_rows)
            def _():
                row_ids = jax.lax.broadcasted_iota(
                    jnp.int32, (block_rows, _LANES), 0)
                masked = jnp.where(row_ids < rows_left, loss, 0.0)
                out_ref[...] += masked.reshape(nfold, _SUBLANES, _LANES).sum(axis=0)

    return kernel


def _elementwise_loss(x, y, gamma, alpha):
    """Plain-jnp QFocalLoss elementwise term (ragged tail + reference)."""
    x = x.astype(jnp.float32)
    y = y.astype(jnp.float32)
    bce = jnp.maximum(x, 0.0) - x * y + jnp.log1p(jnp.exp(-jnp.abs(x)))
    p = jax.nn.sigmoid(x)
    af = y * alpha + (1.0 - y) * (1.0 - alpha)
    mf = jnp.abs(y - p) ** gamma
    return bce * af * mf


def qfocal_loss(pred, true, reduction="mean", gamma=GAMMA, alpha=ALPHA,
                max_block_rows=_MAX_BLOCK_ROWS, num_cores=None,
                fast_sigmoid=True):
    """Quality Focal Loss with a BCEWithLogits base (YOLOv5 QFocalLoss)."""
    assert pred.shape == true.shape, (pred.shape, true.shape)
    n_elems = pred.size
    if n_elems == 0:
        raise ValueError("empty input")
    if reduction not in ("mean", "sum"):
        # TODO(synk): reduction='none' (full elementwise-map output) is not
        # implemented in-kernel; only the reduced 'mean'/'sum' paths are.
        raise NotImplementedError("only 'mean' and 'sum' reductions supported")

    # Flatten; keep the native dtype (bf16 ok) — the f32 upcast is in-kernel.
    flat_p = pred.reshape(-1)
    flat_t = true.reshape(-1)

    # The kernel handles the 1024-aligned bulk; the <1024-element ragged tail
    # is a handful of plain-jnp ops.  No full-array pad copy.
    bulk = (n_elems // _TILE) * _TILE
    tail_n = n_elems - bulk

    total = jnp.float32(0.0)

    if bulk:
        if bulk == n_elems:
            bp, bt = flat_p, flat_t        # aligned case: no slice at all
        else:
            # TODO(synk): a fully zero-copy unaligned path needs a manual-DMA
            # kernel over a memory_space=pl.ANY ref; this static slice copies
            # `bulk` elements but removes the old full-array pad and all bulk
            # in-kernel masking.
            bp, bt = flat_p[:bulk], flat_t[:bulk]

        rows = bulk // _LANES              # multiple of 8 by construction
        p2 = bp.reshape(rows, _LANES)
        t2 = bt.reshape(rows, _LANES)

        block_rows = min(max_block_rows, rows)
        num_blocks = pl.cdiv(rows, block_rows)

        if num_cores is None:
            num_cores = 2 if _multi_tensorcore() else 1
        n_cores = num_cores if num_blocks >= num_cores else 1
        inner_blocks = pl.cdiv(num_blocks, n_cores)
        needs_clamp = n_cores * inner_blocks != num_blocks

        if needs_clamp:
            def in_index_map(c, i):
                # Clamp so the DMA never walks off the array; the duplicated
                # block's compute is skipped in-kernel via a scalar guard.
                return (jnp.minimum(c * inner_blocks + i, num_blocks - 1), 0)
        else:
            def in_index_map(c, i):
                return (c * inner_blocks + i, 0)

        in_spec = pl.BlockSpec((block_rows, _LANES), in_index_map)
        out_spec = pl.BlockSpec((_SUBLANES, _LANES), lambda c, i: (c, 0))

        kernel = _make_kernel(rows, block_rows, inner_blocks, num_blocks,
                              gamma, alpha, fast_sigmoid)

        bytes_in = bulk * (p2.dtype.itemsize + t2.dtype.itemsize)
        cost = pl.CostEstimate(
            flops=25 * bulk,
            transcendentals=4 * bulk,          # exp, log1p, sqrt, rcp
            bytes_accessed=bytes_in + n_cores * _TILE * 4,
        )

        partials = pl.pallas_call(
            kernel,
            out_shape=jax.ShapeDtypeStruct((n_cores * _SUBLANES, _LANES),
                                           jnp.float32),
            grid_spec=pltpu.PrefetchScalarGridSpec(
                num_scalar_prefetch=0,
                grid=(n_cores, inner_blocks),
                in_specs=[in_spec, in_spec],
                out_specs=out_spec,
            ),
            compiler_params=pltpu.CompilerParams(
                dimension_semantics=("parallel", "arbitrary"),
                vmem_limit_bytes=_VMEM_LIMIT_BYTES,
            ),
            cost_estimate=cost,
        )(p2, t2)

        # Single tiny cross-lane reduce outside the kernel.
        total = total + jnp.sum(partials)

    if tail_n:
        total = total + jnp.sum(
            _elementwise_loss(flat_p[bulk:], flat_t[bulk:], gamma, alpha))

    if reduction == "mean":
        return total / jnp.float32(n_elems)
    return total


def _reference(pred, true, gamma=GAMMA, alpha=ALPHA):
    return jnp.mean(_elementwise_loss(pred, true, gamma, alpha))


if __name__ == "__main__":
    key = jax.random.PRNGKey(0)

    # (shape, extra kwargs) — the extra configs exercise the multi-block,
    # two-core-split/duplicate-skip, ragged-last-block and jnp-tail paths at
    # small sizes (correct on any TPU; the split is just a serial loop on 1-TC chips).
    configs = [
        ((2, 4, 16, 16), {}),                                # NCHW logits; aligned, one full block
        ((1155,), {}),                                       # 1024-elem bulk + 131-elem jnp tail
        ((5157,), dict(max_block_rows=8, num_cores=2)),      # 5 blocks, uneven 2-core split
        ((24, 128), dict(max_block_rows=16, num_cores=2)),   # ragged last block (masked path)
    ]

    for idx, (shape, kw) in enumerate(configs):
        k1, k2 = jax.random.split(jax.random.fold_in(key, idx))
        pred = jax.random.normal(k1, shape, dtype=jnp.float32)
        true = jax.random.uniform(k2, shape, dtype=jnp.float32)  # soft targets in [0,1]

        out = jax.block_until_ready(qfocal_loss(pred, true, reduction="mean", **kw))
        ref = _reference(pred, true)
        assert jnp.allclose(out, ref, rtol=1e-4, atol=1e-6), (shape, out, ref)

    print("KERNEL_OK")
</pallas_src>

<mosaic_0001>
module attributes {stable_mosaic.version = 11 : i64} {
  func.func @kernel(%arg0: i32, %arg1: i32, %arg2: memref<16x128xf32, #tpu.memory_space<vmem>>, %arg3: memref<16x128xf32, #tpu.memory_space<vmem>>, %arg4: memref<8x128xf32, #tpu.memory_space<vmem>>) attributes {dimension_semantics = [#tpu.dimension_semantics<parallel>, #tpu.dimension_semantics<arbitrary>], iteration_bounds = array<i64: 1, 1>, scalar_prefetch = 0 : i64, scratch_operands = 0 : i64, tpu.core_type = #tpu.core_type<tc>, window_params = [{transform_indices = @transform_0, window_bounds = array<i64: 16, 128>}, {transform_indices = @transform_1, window_bounds = array<i64: 16, 128>}, {transform_indices = @transform_2, window_bounds = array<i64: 8, 128>}]} {
    %c0_i32 = arith.constant 0 : i32
    %0 = arith.cmpi eq, %arg1, %c0_i32 : i32
    %1 = arith.extui %0 : i1 to i32
    %c0_i32_0 = arith.constant 0 : i32
    %2 = arith.cmpi ne, %1, %c0_i32_0 : i32
    scf.if %2 {
      %cst = arith.constant 0.000000e+00 : f32
      %10 = vector.broadcast %cst : f32 to vector<8x128xf32>
      %c0 = arith.constant 0 : index
      %c0_4 = arith.constant 0 : index
      %11 = vector.load %arg4[%c0, %c0_4] : memref<8x128xf32, #tpu.memory_space<vmem>>, vector<8x128xf32>
      tpu.vector_store %arg4[%c0, %c0_4], %10 {strides = array<i32>} : memref<8x128xf32, #tpu.memory_space<vmem>>, vector<8x128xf32>,
    } else {
    }
    %c1_i32 = arith.constant 1 : i32
    %3 = arith.muli %arg0, %c1_i32 : i32
    %4 = arith.addi %3, %arg1 : i32
    %c16_i32 = arith.constant 16 : i32
    %5 = arith.muli %4, %c16_i32 : i32
    %c16_i32_1 = arith.constant 16 : i32
    %6 = arith.subi %c16_i32_1, %5 : i32
    %c1_i32_2 = arith.constant 1 : i32
    %7 = arith.cmpi slt, %4, %c1_i32_2 : i32
    %8 = arith.extui %7 : i1 to i32
    %c0_i32_3 = arith.constant 0 : i32
    %9 = arith.cmpi ne, %8, %c0_i32_3 : i32
    scf.if %9 {
      %c0 = arith.constant 0 : index
      %c0_4 = arith.constant 0 : index
      %10 = vector.load %arg2[%c0, %c0_4] : memref<16x128xf32, #tpu.memory_space<vmem>>, vector<16x128xf32>
      %c0_5 = arith.constant 0 : index
      %c0_6 = arith.constant 0 : index
      %11 = vector.load %arg3[%c0_5, %c0_6] : memref<16x128xf32, #tpu.memory_space<vmem>>, vector<16x128xf32>
      %12 = math.absf %10 : vector<16x128xf32>
      %cst = arith.constant 0.000000e+00 : f32
      %13 = vector.broadcast %cst : f32 to vector<16x128xf32>
      %14 = arith.subf %13, %12 : vector<16x128xf32>
      %15 = math.exp %14 : vector<16x128xf32>
      %cst_7 = arith.constant 0.000000e+00 : f32
      %16 = vector.broadcast %cst_7 : f32 to vector<16x128xf32>
      %17 = arith.maximumf %10, %16 : vector<16x128xf32>
      %18 = arith.mulf %10, %11 : vector<16x128xf32>
      %19 = arith.subf %17, %18 : vector<16x128xf32>
      %20 = math.log1p %15 : vector<16x128xf32>
      %21 = arith.addf %19, %20 : vector<16x128xf32>
      %cst_8 = arith.constant 1.000000e+00 : f32
      %22 = vector.broadcast %cst_8 : f32 to vector<16x128xf32>
      %23 = arith.addf %22, %15 : vector<16x128xf32>
      %24 = tpu.reciprocal %23 {approx = true} : vector<16x128xf32> -> vector<16x128xf32>
      %25 = arith.mulf %23, %24 : vector<16x128xf32>
      %cst_9 = arith.constant 2.000000e+00 : f32
      %26 = vector.broadcast %cst_9 : f32 to vector<16x128xf32>
      %27 = arith.subf %26, %25 : vector<16x128xf32>
      %28 = arith.mulf %24, %27 : vector<16x128xf32>
      %cst_10 = arith.constant 0.000000e+00 : f32
      %29 = vector.broadcast %cst_10 : f32 to vector<16x128xf32>
      %30 = arith.cmpf oge, %10, %29 : vector<16x128xf32>
      %31 = arith.mulf %15, %28 : vector<16x128xf32>
      %32 = arith.select %30, %28, %31 : vector<16x128xi1>, vector<16x128xf32>
      %cst_11 = arith.constant -5.000000e-01 : f32
      %33 = vector.broadcast %cst_11 : f32 to vector<16x128xf32>
      %34 = arith.mulf %11, %33 : vector<16x128xf32>
      %cst_12 = arith.constant 7.500000e-01 : f32
      %35 = vector.broadcast %cst_12 : f32 to vector<16x128xf32>
      %36 = arith.addf %35, %34 : vector<16x128xf32>
      %37 = arith.subf %11, %32 : vector<16x128xf32>
      %38 = math.absf %37 : vector<16x128xf32>
      %39 = math.sqrt %38 : vector<16x128xf32>
      %40 = arith.mulf %38, %39 : vector<16x128xf32>
      %41 = arith.mulf %21, %36 : vector<16x128xf32>
      %42 = arith.mulf %41, %40 : vector<16x128xf32>
      %c16_i32_13 = arith.constant 16 : i32
      %43 = arith.cmpi sge, %6, %c16_i32_13 : i32
      %44 = arith.extui %43 : i1 to i32
      %c0_i32_14 = arith.constant 0 : i32
      %45 = arith.cmpi ne, %44, %c0_i32_14 : i32
      scf.if %45 {
        %c0_17 = arith.constant 0 : index
        %c0_18 = arith.constant 0 : index
        %49 = vector.load %arg4[%c0_17, %c0_18] : memref<8x128xf32, #tpu.memory_space<vmem>>, vector<8x128xf32>
        %50 = vector.shape_cast %42 : vector<16x128xf32> to vector<2x8x128xf32>
        %cst_19 = arith.constant dense<0.000000e+00> : vector<8x128xf32>
        %51 = vector.multi_reduction <add>, %50, %cst_19 [0] : vector<2x8x128xf32> to vector<8x128xf32>
        %52 = arith.addf %49, %51 : vector<8x128xf32>
        %c0_20 = arith.constant 0 : index
        %c0_21 = arith.constant 0 : index
        %53 = vector.load %arg4[%c0_20, %c0_21] : memref<8x128xf32, #tpu.memory_space<vmem>>, vector<8x128xf32>
        tpu.vector_store %arg4[%c0_20, %c0_21], %52 {strides = array<i32>} : memref<8x128xf32, #tpu.memory_space<vmem>>, vector<8x128xf32>,
      } else {
      }
      %c16_i32_15 = arith.constant 16 : i32
      %46 = arith.cmpi slt, %6, %c16_i32_15 : i32
      %47 = arith.extui %46 : i1 to i32
      %c0_i32_16 = arith.constant 0 : i32
      %48 = arith.cmpi ne, %47, %c0_i32_16 : i32
      scf.if %48 {
        %49 = tpu.iota {dimensions = array<i32: 0>} : vector<16x128xi32>
        %50 = vector.broadcast %6 : i32 to vector<16x128xi32>
        %51 = arith.cmpi slt, %49, %50 : vector<16x128xi32>
        %cst_17 = arith.constant 0.000000e+00 : f32
        %52 = vector.broadcast %cst_17 : f32 to vector<16x128xf32>
        %53 = arith.select %51, %42, %52 : vector<16x128xi1>, vector<16x128xf32>
        %c0_18 = arith.constant 0 : index
        %c0_19 = arith.constant 0 : index
        %54 = vector.load %arg4[%c0_18, %c0_19] : memref<8x128xf32, #tpu.memory_space<vmem>>, vector<8x128xf32>
        %55 = vector.shape_cast %53 : vector<16x128xf32> to vector<2x8x128xf32>
        %cst_20 = arith.constant dense<0.000000e+00> : vector<8x128xf32>
        %56 = vector.multi_reduction <add>, %55, %cst_20 [0] : vector<2x8x128xf32> to vector<8x128xf32>
        %57 = arith.addf %54, %56 : vector<8x128xf32>
        %c0_21 = arith.constant 0 : index
        %c0_22 = arith.constant 0 : index
        %58 = vector.load %arg4[%c0_21, %c0_22] : memref<8x128xf32, #tpu.memory_space<vmem>>, vector<8x128xf32>
        tpu.vector_store %arg4[%c0_21, %c0_22], %57 {strides = array<i32>} : memref<8x128xf32, #tpu.memory_space<vmem>>, vector<8x128xf32>,
      } else {
      }
    } else {
    }
    return
  }
  func.func @transform_0(%arg0: i32, %arg1: i32) -> (i32, i32) {
    %c1_i32 = arith.constant 1 : i32
    %0 = arith.muli %arg0, %c1_i32 : i32
    %1 = arith.addi %0, %arg1 : i32
    %c0_i32 = arith.constant 0 : i32
    %c0_i32_0 = arith.constant 0 : i32
    return %1, %c0_i32 : i32, i32
  }
  func.func @transform_1(%arg0: i32, %arg1: i32) -> (i32, i32) {
    %c1_i32 = arith.constant 1 : i32
    %0 = arith.muli %arg0, %c1_i32 : i32
    %1 = arith.addi %0, %arg1 : i32
    %c0_i32 = arith.constant 0 : i32
    %c0_i32_0 = arith.constant 0 : i32
    return %1, %c0_i32 : i32, i32
  }
  func.func @transform_2(%arg0: i32, %arg1: i32) -> (i32, i32) {
    %c0_i32 = arith.constant 0 : i32
    %c0_i32_0 = arith.constant 0 : i32
    return %arg0, %c0_i32 : i32, i32
  }
}

</mosaic_0001>

<bundles_post_ra>
// kernel: tpu_custom_call.1
= control target key start
LH: loop header
LB: loop body
LE: loop exit
PB: predicated region body
PF: predicated region fallthrough
CT: control target
= control target key end

     0   :  { %7 = vsyncpa [#allocation3], 0  ;;  %s355_s0 = inlined_call_operand.hbm [shape: f32[16,128], index: 0, kind: input, shape index: {}]   ;;  %s356_s1 = inlined_call_operand.hbm [shape: f32[16,128], index: 1, kind: input, shape index: {}]   ;;  %s357_s2 = inlined_call_operand.hbm [shape: f32[8,128], index: 2, kind: output, shape index: {}]  }
   0x1   :  { %8 = vsyncpa [#allocation6], 0 }
   0x2   :  { %9 = vsyncpa [#allocation4], 0  ;;  %s18_s11 = sshll.u32 %s355_s0, 4  ;;  %s302_s12 = smov [#allocation2]   ;;  %s19_s11 = int_to_ptr.hbm [resolvable:$true] %s18_s11 }
   0x3   :  { %s20_s13 = sshll.u32 %s302_s12, 4  ;;  %s35_s16 = sshll.u32 %s356_s1, 4  ;;  %s21_s13 = int_to_ptr.vmem [resolvable:$true] %s20_s13  ;;  %s36_s16 = int_to_ptr.hbm [resolvable:$true] %s35_s16 }
   0x4   :  { %s303_s17 = smov 128   ;;  %s304_s18 = smov 8  }
   0x5   :  { %26 = dma.hbm_to_vmem [thread:$0]  %s19_s11, 256, %s21_s13, [#allocation3], %s303_s17, %s303_s17, %s304_s18  }
   0x6   :  { %s305_s19 = smov [#allocation5]  }
   0x7   :  { %s37_s20 = sshll.u32 %s305_s19, 4  ;;  %s38_s20 = int_to_ptr.vmem [resolvable:$true] %s37_s20 }
   0x8   :  { %43 = dma.hbm_to_vmem [thread:$0]  %s36_s16, 256, %s38_s20, [#allocation6], %s303_s17, %s303_s17, %s304_s18  }
   0x9   :  { %296 = dma.done.wait [#allocation3], 256  }
   0xa   :  { %297 = vsyncadd [#allocation3], 4294967040 }
   0xb   :  { %298 = dma.done.wait [#allocation6], 256  }
   0xc   :  { %299 = vsyncadd [#allocation6], 4294967040  ;;  %v328_v0 = vld [vmem:[#allocation2] sm:$0xff]  ;;  %v330_v1 = vld [vmem:[#allocation2 + $0x8] sm:$0xff]  ;;  %s306_s0 = smov [#allocation7]   ;;  %s191_s23 = sshll.u32 %s357_s2, 4  ;;  %s192_s23 = int_to_ptr.hbm [resolvable:$true] %s191_s23 }
   0xd   :  { %v72_v2 = vand.u32 2147483647, %v328_v0  ;;  %v73_v3 = vand.u32 2147483647, %v330_v1  ;;  %vm116_vm0 = vcmp.ge.f32.partialorder %v328_v0, 0.0  ;;  %v70_v20 = vld [vmem:[#allocation5] sm:$0xff] }
   0xe   :  { %vm117_vm1 = vcmp.ge.f32.partialorder %v330_v1, 0.0  ;;  %v71_v22 = vld [vmem:[#allocation5 + $0x8] sm:$0xff]  ;;  %v80_v40 = vmax.f32 %v328_v0, 0.0  ;;  %v81_v41 = vmax.f32 %v330_v1, 0.0  ;;  %v82_v42 = vmul.f32 %v70_v20, %v328_v0  ;;  %s189_s1 = sshll.u32 %s306_s0, 4  ;;  %s190_s1 = int_to_ptr.vmem [resolvable:$true] %s189_s1 }
   0xf   :  { %v74_v4 = vsub.f32 0.0, %v72_v2  ;;  %v75_v5 = vsub.f32 0.0, %v73_v3  ;;  %v83_v44 = vmul.f32 %v71_v22, %v330_v1  ;;  %v122_v55 = vmul.f32 -0.5, %v70_v20 }
  0x10   :  { %v84_v54 = vsub.f32 %v80_v40, %v82_v42  ;;  %v123_v56 = vmul.f32 -0.5, %v71_v22 }
  0x11   :  { %v76_v6 = vmul.f32 1.442695, %v74_v4  ;;  %v78_v7 = vmul.f32 1.442695, %v75_v5  ;;  %v85_v58 = vsub.f32 %v81_v41, %v83_v44  ;;  %v124_v1 = vadd.f32 0.75, %v122_v55 }
  0x12   :  { %v125_v2 = vadd.f32 0.75, %v123_v56 }
  0x13   :  { %208 = vpow2.f32 %v76_v6 }
  0x14   :  { %210 = vpow2.f32 %v78_v7 }
  0x19   :  { %v209_v8 = vpop.eup %208 }
  0x1a   :  { %v211_v9 = vpop.eup %210  ;;  %v86_v10 = vadd.f32 1.0, %v209_v8  ;;  %v89_v30 = vmul.f32 -0.5, %v209_v8  ;;  %v92_v35 = vand.u32 2147483647, %v209_v8 }
  0x1b   :  { %v95_v11 = vadd.f32 1.0, %v211_v9  ;;  %v98_v31 = vmul.f32 -0.5, %v211_v9  ;;  %v101_v38 = vand.u32 2147483647, %v211_v9 }
  0x1c   :  { %212 = vrcp.f32 %v86_v10  ;;  %v90_v33 = vadd.f32 1.0, %v89_v30  ;;  %vm340_vm2 = vcmp.lt.f32.partialorder %v92_v35, 0.0004427343 }
  0x1d   :  { %214 = vrcp.f32 %v95_v11  ;;  %v99_v36 = vadd.f32 1.0, %v98_v31  ;;  %vm344_vm3 = vcmp.lt.f32.partialorder %v101_v38, 0.0004427343 }
  0x1e   :  { %216 = vlog2.f32 %v86_v10  ;;  %v91_v46 = vmul.f32 %v209_v8, %v90_v33 }
  0x1f   :  { %218 = vlog2.f32 %v95_v11  ;;  %v100_v50 = vmul.f32 %v211_v9, %v99_v36 }
  0x22   :  { %v213_v12 = vpop.eup %212 }
  0x23   :  { %v215_v13 = vpop.eup %214  ;;  %v110_v14 = vmul.f32 %v213_v12, %v86_v10 }
  0x24   :  { %v111_v15 = vmul.f32 %v215_v13, %v95_v11  ;;  %v217_v32 = vpop.eup %216 }
  0x25   :  { %v112_v16 = vsub.f32 2.0, %v110_v14  ;;  %v219_v34 = vpop.eup %218  ;;  %v88_v45 = vmul.f32 0.6931472, %v217_v32 }
  0x26   :  { %v113_v17 = vsub.f32 2.0, %v111_v15  ;;  %v97_v49 = vmul.f32 0.6931472, %v219_v34 }
  0x27   :  { %v114_v18 = vmul.f32 %v213_v12, %v112_v16  ;;  %v94_v59 = vsel %vm340_vm2, %v91_v46, %v88_v45 }
  0x28   :  { %v115_v19 = vmul.f32 %v215_v13, %v113_v17  ;;  %v103_v61 = vsel %vm344_vm3, %v100_v50, %v97_v49  ;;  %v104_v0 = vadd.f32 %v94_v59, %v84_v54 }
  0x29   :  { %v118_v21 = vmul.f32 %v209_v8, %v114_v18  ;;  %v105_v4 = vadd.f32 %v103_v61, %v85_v58 }
  0x2a   :  { %v119_v23 = vmul.f32 %v211_v9, %v115_v19  ;;  %v156_v11 = vmul.f32 %v124_v1, %v104_v0 }
  0x2b   :  { %v120_v24 = vsel %vm116_vm0, %v114_v18, %v118_v21  ;;  %v157_v14 = vmul.f32 %v125_v2, %v105_v4 }
  0x2c   :  { %v121_v25 = vsel %vm117_vm1, %v115_v19, %v119_v23  ;;  %v126_v26 = vsub.f32 %v70_v20, %v120_v24 }
  0x2d   :  { %v127_v27 = vsub.f32 %v71_v22, %v121_v25 }
  0x2e   :  { %v128_v28 = vand.u32 2147483647, %v126_v26 }
  0x2f   :  { %v129_v29 = vand.u32 2147483647, %v127_v27 }
  0x30   :  { %220 = vrsqrt.f32 %v128_v28  ;;  %vm137_vm4 = vcmp.eq.f32.partialorder %v128_v28, inf  ;;  %v140_v5 = vand.u32 2147483648, %v128_v28  ;;  %vm139_vm5 = vcmp.eq.f32.partialorder %v128_v28, 0.0 }
  0x31   :  { %222 = vrsqrt.f32 %v129_v29  ;;  %vm149_vm6 = vcmp.eq.f32.partialorder %v129_v29, inf  ;;  %v152_v8 = vand.u32 2147483648, %v129_v29  ;;  %vm151_vm7 = vcmp.eq.f32.partialorder %v129_v29, 0.0 }
  0x36   :  { %v221_v37 = vpop.eup %220 }
  0x37   :  { %v223_v39 = vpop.eup %222  ;;  %v131_v43 = vmul.f32 %v221_v37, %v128_v28 }
  0x38   :  { %v143_v47 = vmul.f32 %v223_v39, %v129_v29 }
  0x39   :  { %v132_v51 = vmul.f32 %v221_v37, %v131_v43 }
  0x3a   :  { %v144_v53 = vmul.f32 %v223_v39, %v143_v47 }
  0x3b   :  { %v133_v57 = vmul.f32 0.5, %v132_v51 }
  0x3c   :  { %v145_v60 = vmul.f32 0.5, %v144_v53 }
  0x3d   :  { %v134_v62 = vsub.f32 1.5, %v133_v57 }
  0x3e   :  { %v146_v63 = vsub.f32 1.5, %v145_v60 }
  0x3f   :  { %v135_v3 = vmul.f32 %v221_v37, %v134_v62 }
  0x40   :  { %v147_v6 = vmul.f32 %v223_v39, %v146_v63 }
  0x41   :  { %v136_v7 = vmul.f32 %v135_v3, %v128_v28 }
  0x42   :  { %v148_v9 = vmul.f32 %v147_v6, %v129_v29 }
  0x43   :  { %v138_v10 = vsel %vm137_vm4, %v128_v28, %v136_v7 }
  0x44   :  { %v141_v12 = vsel %vm139_vm5, %v140_v5, %v138_v10  ;;  %v150_v13 = vsel %vm149_vm6, %v129_v29, %v148_v9 }
  0x45   :  { %v153_v15 = vsel %vm151_vm7, %v152_v8, %v150_v13  ;;  %v154_v16 = vmul.f32 %v141_v12, %v128_v28 }
  0x46   :  { %v155_v17 = vmul.f32 %v153_v15, %v129_v29 }
  0x47   :  { %v158_v18 = vmul.f32 %v156_v11, %v154_v16 }
  0x48   :  { %v159_v19 = vmul.f32 %v157_v14, %v155_v17 }
  0x4a   :  { %v165_v20 = vadd.f32 %v159_v19, %v158_v18 }
  0x4c   :  { %167 = vst [vmem:[#allocation7] sm:$0xff] %v165_v20 }
  0x4d   :  { %194 = dma.vmem_to_hbm [thread:$0]  %s190_s1, 128, %s192_s23, [#allocation4]  }
  0x4e   :  { %300 = dma.done.wait [#allocation4], 128  }
  0x4f   :  { %301 = vsyncadd [#allocation4], 4294967168 }
  0x50   :  { %199 = vsyncpa [#allocation3], 1 }
  0x51   :  { %200 = vsyncpa [#allocation6], 1 }
  0x52   :  { %201 = vsyncpa [#allocation4], 1 }

</bundles_post_ra>
